<compile_context>
chip_gen: v7x
topology: tpu7x:2x2x1
jax: 0.10.0
libtpu: 0.0.40
codegen_flags: <defaults>
</compile_context>

<pallas_src>
import math

import jax
import jax.numpy as jnp
from jax.experimental import pallas as pl
from jax.experimental.pallas import tpu as pltpu


def _cdiv(a, b):
    return -(-a // b)


def _round_up(x, m):
    return _cdiv(x, m) * m


# --------------------------------------------------------------------------- #
# Kernels
# --------------------------------------------------------------------------- #
def _linear_kernel_single(x_ref, w_ref, o_ref):
    # Whole contraction fits in one K step: direct store, no accumulator needed.
    o_ref[...] = jnp.dot(
        x_ref[...], w_ref[...], preferred_element_type=jnp.float32
    ).astype(o_ref.dtype)


def _linear_kernel_accum_out(x_ref, w_ref, o_ref):
    # f32 output block is resident across the K grid axis -> accumulate into it
    # directly (saves tm*tn*4 B of VMEM and the final copy per output tile).
    @pl.when(pl.program_id(2) == 0)
    def _():
        o_ref[...] = jnp.zeros_like(o_ref)

    o_ref[...] += jnp.dot(x_ref[...], w_ref[...], preferred_element_type=jnp.float32)


def _linear_kernel_scratch(x_ref, w_ref, o_ref, acc_ref):
    # Low-precision output: accumulate in an f32 VMEM scratch, cast on last K step.
    @pl.when(pl.program_id(2) == 0)
    def _():
        acc_ref[...] = jnp.zeros_like(acc_ref)

    acc_ref[...] += jnp.dot(x_ref[...], w_ref[...], preferred_element_type=jnp.float32)

    @pl.when(pl.program_id(2) == pl.num_programs(2) - 1)
    def _():
        o_ref[...] = acc_ref[...].astype(o_ref.dtype)


# --------------------------------------------------------------------------- #
# Tiling plan
# --------------------------------------------------------------------------- #
_TK_CANDIDATES = (2048, 1024, 512, 256, 128)
_MAX_SINGLE_K = 2048


def _plan_k(k):
    """Returns (tk, k_run) for a contraction length k (k_run >= k, tk | k_run)."""
    if k <= _MAX_SINGLE_K:
        return k, k                      # single full-dim K block (no pad needed)
    for cand in _TK_CANDIDATES:
        if k % cand == 0:
            return cand, k
    # Rare: large K not a multiple of 128 -> pad (done once in prepare_linear_weight).
    return 1024, _round_up(k, 1024)


def _pick_mn_tiles(m, n, x_itemsize):
    """MXU-friendly, lane-dense, VMEM-safe tiles; >=2 parallel blocks when possible."""
    row_align = {4: 8, 2: 16, 1: 32}.get(x_itemsize, 8)   # sublane packing per dtype
    tm = min(512, _round_up(m, row_align))
    tn = n if n < 128 else min(512, _round_up(n, 128))    # lane-dense stores
    # v7x has 2 TensorCores: make sure a "parallel" axis has >=2 blocks if it can.
    if _cdiv(m, tm) * _cdiv(n, tn) < 2:
        if n > 128:
            tn = _round_up(_cdiv(n, 2), 128)
        elif m > 2 * row_align:
            tm = _round_up(_cdiv(m, 2), row_align)
    return tm, tn


# --------------------------------------------------------------------------- #
# Public API
# --------------------------------------------------------------------------- #
def prepare_linear_weight(weight):
    """One-time transform of a PyTorch-layout (out_features, in_features) weight
    into the kernel layout (in_features [K-padded], out_features).

    Do this once per parameter (outside the training/inference step) so the hot
    path never re-transposes or re-pads the weight in HBM.
    """
    out_features, in_features = weight.shape
    _, k_run = _plan_k(in_features)
    w_t = jnp.asarray(weight).T                      # (in_features, out_features)
    if k_run != in_features:
        w_t = jnp.pad(w_t, ((0, k_run - in_features), (0, 0)))  # zeros: exact for sum
    return w_t


@jax.jit
def linear_forward_prepared(x, w_t):
    """y = x @ W.T with W already in kernel layout (k_pad, out_features).

    x:   (..., in_features)
    w_t: (k_pad, out_features) from prepare_linear_weight()
    """
    in_features = x.shape[-1]
    k_w, out_features = w_t.shape
    assert in_features <= k_w, "x feature dim exceeds (padded) weight K dim"

    lead = x.shape[:-1]
    m = math.prod(lead) if lead else 1
    x2d = x.reshape(m, in_features)

    tk, k_run = _plan_k(k_w)
    if k_run != k_w:
        # Fallback only: weight was not produced by prepare_linear_weight().
        w_t = jnp.pad(w_t, ((0, k_run - k_w), (0, 0)))
    if k_run != in_features:
        # Only the (small) activation is padded per call; the weight is pre-padded.
        x2d = jnp.pad(x2d, ((0, 0), (0, k_run - in_features)))

    out_dtype = x.dtype
    tm, tn = _pick_mn_tiles(m, out_features, x.dtype.itemsize)
    mb, nb, kb = _cdiv(m, tm), _cdiv(out_features, tn), k_run // tk
    grid = (mb, nb, kb)

    if kb == 1:
        kernel, scratch = _linear_kernel_single, []
    elif out_dtype == jnp.float32:
        kernel, scratch = _linear_kernel_accum_out, []
    else:
        kernel, scratch = _linear_kernel_scratch, [pltpu.VMEM((tm, tn), jnp.float32)]

    # VMEM budget: double-buffered input/output tiles (+ optional f32 accumulator).
    x_b = x2d.dtype.itemsize
    w_b = w_t.dtype.itemsize
    o_b = x.dtype.itemsize
    working = 2 * (tm * tk * x_b + tk * tn * w_b + tm * tn * o_b)
    if scratch:
        working += tm * tn * 4
    # Explicit limit: overrides v5e's 16 MiB scoped default, stays < v7x's 64 MiB.
    vmem_limit = int(min(56 * 1024 * 1024, max(working + 8 * 1024 * 1024,
                                               24 * 1024 * 1024)))

    flops = 2 * m * in_features * out_features
    bytes_accessed = (
        x2d.size * x_b * nb          # x is re-read once per N block column
        + w_t.size * w_b * mb        # W is re-read once per M block row
        + m * out_features * o_b     # output written once
    )

    out2d = pl.pallas_call(
        kernel,
        out_shape=jax.ShapeDtypeStruct((m, out_features), out_dtype),
        grid_spec=pltpu.PrefetchScalarGridSpec(
            num_scalar_prefetch=0,
            grid=grid,
            in_specs=[
                pl.BlockSpec((tm, tk), lambda i, j, kk: (i, kk)),   # x tile
                pl.BlockSpec((tk, tn), lambda i, j, kk: (kk, j)),   # W^T tile (K, N)
            ],
            out_specs=pl.BlockSpec((tm, tn), lambda i, j, kk: (i, j)),
            scratch_shapes=scratch,
        ),
        compiler_params=pltpu.CompilerParams(
            dimension_semantics=("parallel", "parallel", "arbitrary"),
            vmem_limit_bytes=vmem_limit,
        ),
        cost_estimate=pl.CostEstimate(
            flops=flops, transcendentals=0, bytes_accessed=bytes_accessed
        ),
    )(x2d, w_t)

    return out2d.reshape(*lead, out_features)


def linear_forward(x, weight):
    """Convenience entry point with the PyTorch convention: weight is
    (out_features, in_features) and the result is x @ weight.T.

    For repeated calls on the same parameter, call prepare_linear_weight(weight)
    once and reuse linear_forward_prepared(x, w_t) to avoid the per-call
    transpose/pad of the weight.
    """
    return linear_forward_prepared(x, prepare_linear_weight(weight))


def init_linear_weight(key, in_features, out_features, dtype=jnp.float32):
    """Matches torch.nn.init.trunc_normal_(w, 0, std, -3*std, 3*std)."""
    std = 2.0 / (in_features + out_features)
    w = jax.random.truncated_normal(
        key, lower=-3.0, upper=3.0, shape=(out_features, in_features),
        dtype=jnp.float32,
    ) * std
    return w.astype(dtype)


if __name__ == "__main__":
    key = jax.random.PRNGKey(0)
    k1, k2, k3, k4, k5, k6 = jax.random.split(key, 6)

    # Test 1: small typical shapes (single K step, f32), prepared-weight hot path.
    x = jax.random.normal(k1, (2, 8, 64), dtype=jnp.float32)
    w = init_linear_weight(k2, 64, 128)
    w_t = prepare_linear_weight(w)
    y = linear_forward_prepared(x, w_t)
    jax.block_until_ready(y)
    y_ref = jnp.einsum("bsi,oi->bso", x, w)
    assert y.shape == (2, 8, 128)
    assert jnp.allclose(y, y_ref, atol=2e-3, rtol=2e-3)

    # Test 2: multi-K-step path (K=2560 -> tk=512, 5 steps), f32 accumulate-into-output.
    x2 = jax.random.normal(k3, (2, 8, 2560), dtype=jnp.float32)
    w2 = init_linear_weight(k4, 2560, 256)
    y2 = linear_forward(x2, w2)
    jax.block_until_ready(y2)
    y2_ref = jnp.einsum("bsi,oi->bso", x2, w2)
    assert y2.shape == (2, 8, 256)
    assert jnp.allclose(y2, y2_ref, atol=5e-3, rtol=5e-3)

    # Test 3: uneven M / N (masked edge blocks) + the >=2-parallel-block split.
    x3 = jax.random.normal(k5, (3, 5, 64), dtype=jnp.float32)
    w3 = init_linear_weight(k6, 64, 200)
    y3 = linear_forward(x3, w3)
    jax.block_until_ready(y3)
    y3_ref = jnp.einsum("bsi,oi->bso", x3, w3)
    assert y3.shape == (3, 5, 200)
    assert jnp.allclose(y3, y3_ref, atol=2e-3, rtol=2e-3)

    # Test 4: bf16 activations/weights (bf16-native MXU), multi-K, scratch-accumulator.
    x4 = jax.random.normal(k1, (2, 8, 2560), dtype=jnp.float32).astype(jnp.bfloat16)
    w4 = init_linear_weight(k2, 2560, 128, dtype=jnp.bfloat16)
    y4 = linear_forward(x4, w4)
    jax.block_until_ready(y4)
    y4_ref = jnp.dot(x4.astype(jnp.float32), w4.astype(jnp.float32).T).reshape(2, 8, 128)
    assert y4.shape == (2, 8, 128)
    assert jnp.allclose(y4.astype(jnp.float32), y4_ref, atol=5e-3, rtol=5e-2)

    print("KERNEL_OK")
</pallas_src>

<mosaic_0001>
module attributes {stable_mosaic.version = 11 : i64} {
  func.func @_linear_kernel_single(%arg0: i32, %arg1: i32, %arg2: i32, %arg3: memref<16x64xf32, #tpu.memory_space<vmem>>, %arg4: memref<64x128xf32, #tpu.memory_space<vmem>>, %arg5: memref<16x128xf32, #tpu.memory_space<vmem>>) attributes {dimension_semantics = [#tpu.dimension_semantics<parallel>, #tpu.dimension_semantics<parallel>, #tpu.dimension_semantics<arbitrary>], iteration_bounds = array<i64: 1, 1, 1>, scalar_prefetch = 0 : i64, scratch_operands = 0 : i64, tpu.core_type = #tpu.core_type<tc>, window_params = [{transform_indices = @transform_0, window_bounds = array<i64: 16, 64>}, {transform_indices = @transform_1, window_bounds = array<i64: 64, 128>}, {transform_indices = @transform_2, window_bounds = array<i64: 16, 128>}]} {
    %c0 = arith.constant 0 : index
    %c0_0 = arith.constant 0 : index
    %0 = vector.load %arg3[%c0, %c0_0] : memref<16x64xf32, #tpu.memory_space<vmem>>, vector<16x64xf32>
    %c0_1 = arith.constant 0 : index
    %c0_2 = arith.constant 0 : index
    %1 = vector.load %arg4[%c0_1, %c0_2] : memref<64x128xf32, #tpu.memory_space<vmem>>, vector<64x128xf32>
    %cst = arith.constant dense<0.000000e+00> : vector<16x128xf32>
    %2 = tpu.matmul %0, %1, %cst {dimension_numbers = #tpu.dot_dimension_numbers<[1], [0], [0], [1], [0, 0, 1, 1], [], []>} : vector<16x64xf32>, vector<64x128xf32>, vector<16x128xf32> -> vector<16x128xf32>
    %c0_3 = arith.constant 0 : index
    %c0_4 = arith.constant 0 : index
    %3 = vector.load %arg5[%c0_3, %c0_4] : memref<16x128xf32, #tpu.memory_space<vmem>>, vector<16x128xf32>
    tpu.vector_store %arg5[%c0_3, %c0_4], %2 {strides = array<i32>} : memref<16x128xf32, #tpu.memory_space<vmem>>, vector<16x128xf32>,
    return
  }
  func.func @transform_0(%arg0: i32, %arg1: i32, %arg2: i32) -> (i32, i32) {
    %c0_i32 = arith.constant 0 : i32
    return %arg0, %arg2 : i32, i32
  }
  func.func @transform_1(%arg0: i32, %arg1: i32, %arg2: i32) -> (i32, i32) {
    %c0_i32 = arith.constant 0 : i32
    return %arg2, %arg1 : i32, i32
  }
  func.func @transform_2(%arg0: i32, %arg1: i32, %arg2: i32) -> (i32, i32) {
    %c0_i32 = arith.constant 0 : i32
    return %arg0, %arg1 : i32, i32
  }
}

</mosaic_0001>

<bundles_post_ra>
// kernel: linear_forward_prepared.1
= control target key start
LH: loop header
LB: loop body
LE: loop exit
PB: predicated region body
PF: predicated region fallthrough
CT: control target
= control target key end

     0   :  { %7 = vsyncpa [#allocation3], 0  ;;  %s343_s0 = inlined_call_operand.hbm [shape: f32[16,64], index: 0, kind: input, shape index: {}]   ;;  %s344_s1 = inlined_call_operand.hbm [shape: f32[64,128], index: 1, kind: input, shape index: {}]   ;;  %s345_s2 = inlined_call_operand.hbm [shape: f32[16,128], index: 2, kind: output, shape index: {}]  }
   0x1   :  { %8 = vsyncpa [#allocation6], 0 }
   0x2   :  { %9 = vsyncpa [#allocation4], 0  ;;  %s276_s9 = smov [#allocation2]   ;;  %s204_s13 = scalar_lea.hbm %s343_s0, 256 }
   0x3   :  { %s15_s10 = sshll.u32 %s276_s9, 4  ;;  %p205_p0 = scmp.ne.s32.totalorder %s343_s0, %s204_s13  ;;  %s16_s10 = int_to_ptr.vmem [resolvable:$true] %s15_s10 }
   0x4   :  { %p208_p1 = scmp.lt.u32.totalorder %s204_s13, %s343_s0 }
   0x6   :  { %p210_p2 = pnand %p208_p1, %p205_p0 }
   0x8   :  { %213 = shalt.err (!%p210_p2)
}
   0x9   :  { %s214_s18 = scalar_lea.vmem %s16_s10, 256  ;;  %p219_p4 = scmp.lt.s32.totalorder %s16_s10, %s16_s10 }
   0xa   :  { %p215_p3 = scmp.ne.s32.totalorder %s16_s10, %s214_s18  ;;  %p220_p5 = scmp.lt.s32.totalorder %s214_s18, %s214_s18 }
   0xc   :  { %p221_p6 = por %p220_p5, %p219_p4 }
   0xe   :  { %p222_p7 = pnand %p221_p6, %p215_p3 }
  0x10   :  { %225 = shalt.err (!%p222_p7)
}
  0x11   :  { %s277_s19 = smov 128   ;;  %s278_s20 = smov 8  }
  0x12   :  { %21 = dma.hbm_to_vmem [thread:$0]  %s343_s0, 256, %s16_s10, [#allocation3], %s277_s19, %s277_s19, %s278_s20  }
  0x13   :  { %s279_s23 = smov [#allocation5]   ;;  %s226_s27 = scalar_lea.hbm %s344_s1, 1024 }
  0x14   :  { %s27_s24 = sshll.u32 %s279_s23, 4  ;;  %p227_p8 = scmp.ne.s32.totalorder %s344_s1, %s226_s27  ;;  %s28_s24 = int_to_ptr.vmem [resolvable:$true] %s27_s24 }
  0x15   :  { %p230_p9 = scmp.lt.u32.totalorder %s226_s27, %s344_s1 }
  0x17   :  { %p232_p10 = pnand %p230_p9, %p227_p8 }
  0x19   :  { %235 = shalt.err (!%p232_p10)
}
  0x1a   :  { %s236_s4 = scalar_lea.vmem %s28_s24, 1024  ;;  %p241_p12 = scmp.lt.s32.totalorder %s28_s24, %s28_s24 }
  0x1b   :  { %p237_p11 = scmp.ne.s32.totalorder %s28_s24, %s236_s4  ;;  %p242_p13 = scmp.lt.s32.totalorder %s236_s4, %s236_s4 }
  0x1d   :  { %p243_p0 = por %p242_p13, %p241_p12 }
  0x1f   :  { %p244_p1 = pnand %p243_p0, %p237_p11 }
  0x21   :  { %247 = shalt.err (!%p244_p1)
}
  0x22   :  { %33 = dma.hbm_to_vmem [thread:$0]  %s344_s1, 1024, %s28_s24, [#allocation6], %s277_s19, %s277_s19, %s278_s20  }
  0x23   :  { %270 = dma.done.wait [#allocation3], 256  }
  0x24   :  { %271 = vsyncadd [#allocation3], 4294967040 }
  0x25   :  { %272 = dma.done.wait [#allocation6], 1024  }
  0x26   :  { %273 = vsyncadd [#allocation6], 4294966272  ;;  %v42_v0 = vld [vmem:[#allocation5] sm:$0xff]  ;;  %v43_v1 = vld [vmem:[#allocation5 + $0x8] sm:$0xff]  ;;  %vm50_vm0 = vcmask 523264   ;;  %s280_s1 = smov [#allocation7]  }
  0x27   :  { %v44_v2 = vld [vmem:[#allocation5 + $0x10] sm:$0xff]  ;;  %v183_v3 = vpack.c.bf16 %v43_v1, %v42_v0  ;;  %v45_v4 = vld [vmem:[#allocation5 + $0x18] sm:$0xff]  ;;  %v46_v6 = vld [vmem:[#allocation5 + $0x20] sm:$0xff]  ;;  %s139_s6 = sshll.u32 %s280_s1, 4  ;;  %s140_s6 = int_to_ptr.vmem [resolvable:$true] %s139_s6 }
  0x28   :  { %v187_v5 = vpack.c.bf16 %v45_v4, %v44_v2  ;;  %v47_v7 = vld [vmem:[#allocation5 + $0x28] sm:$0xff]  ;;  %v40_v8 = vld [vmem:[#allocation2] sm:$0xff]  ;;  %v49_v11 = vld [vmem:[#allocation5 + $0x38] sm:$0xff]  ;;  %s248_s7 = scalar_lea.vmem %s140_s6, 256  ;;  %p253_p3 = scmp.lt.s32.totalorder %s140_s6, %s140_s6 }
  0x29   :  { %184 = vmatprep.subr.bf16.mxu0 %v183_v3  ;;  %180 = vmatprep.mubr.msk.f32.mxu0 %vm50_vm0, %v40_v8  ;;  %v191_v9 = vpack.c.bf16 %v47_v7, %v46_v6  ;;  %v48_v10 = vld [vmem:[#allocation5 + $0x30] sm:$0xff]  ;;  %v41_v13 = vld [vmem:[#allocation2 + $0x8] sm:$0xff]  ;;  %p249_p2 = scmp.ne.s32.totalorder %s140_s6, %s248_s7  ;;  %p254_p4 = scmp.lt.s32.totalorder %s248_s7, %s248_s7 }
  0x2a   :  { %186 = vmatpush3.bf16.msra.mxu0 %v183_v3  ;;  %v195_v12 = vpack.c.bf16 %v49_v11, %v48_v10 }
  0x2b   :  { %188 = vmatprep.subr.bf16.mxu0 %v187_v5  ;;  %p255_p5 = por %p254_p4, %p253_p3 }
  0x2d   :  { %p256_p6 = pnand %p255_p5, %p249_p2 }
  0x2e   :  { %190 = vmatpush3.bf16.msra.mxu0 %v187_v5 }
  0x2f   :  { %192 = vmatprep.subr.bf16.mxu0 %v191_v9 }
  0x32   :  { %194 = vmatpush3.bf16.msra.mxu0 %v191_v9 }
  0x33   :  { %196 = vmatprep.subr.bf16.mxu0 %v195_v12 }
  0x36   :  { %198 = vmatpush3.bf16.msra.mxu0 %v195_v12 }
  0x39   :  { %181 = vmatmul.mubr.msk.f32.vlgmr.msra.gmra.mrb[0].mxu0 %vm50_vm0, %v41_v13 }
 0x10c   :  { %v182_v14 = vpop.f32.mrb[0].mxu0 }
 0x10d   :  { %133 = vst [vmem:[#allocation7 + $0x8] sm:$0xff] %v182_v14  ;;  %v123_v15 = vpop.f32.mrb[1].mxu0 }
 0x10e   :  { %132 = vst [vmem:[#allocation7] sm:$0xff] %v123_v15 }
 0x10f   :  { %259 = shalt.err (!%p256_p6)
}
 0x110   :  { %s260_s10 = scalar_lea.hbm %s345_s2, 256 }
 0x111   :  { %p261_p7 = scmp.ne.s32.totalorder %s345_s2, %s260_s10  ;;  %p264_p8 = scmp.lt.u32.totalorder %s260_s10, %s345_s2 }
 0x113   :  { %p266_p9 = pnand %p264_p8, %p261_p7 }
 0x115   :  { %269 = shalt.err (!%p266_p9)
}
 0x116   :  { %145 = dma.vmem_to_hbm [thread:$0]  %s140_s6, 256, %s345_s2, [#allocation4], %s277_s19, %s277_s19, %s278_s20  }
 0x117   :  { %274 = dma.done.wait [#allocation4], 256  }
 0x118   :  { %275 = vsyncadd [#allocation4], 4294967040 }
 0x119   :  { %149 = vsyncpa [#allocation3], 1 }
 0x11a   :  { %150 = vsyncpa [#allocation6], 1 }
 0x11b   :  { %151 = vsyncpa [#allocation4], 1 }

</bundles_post_ra>
